<compile_context>
chip_gen: v7x
topology: tpu7x:2x2x1
jax: 0.10.0
libtpu: 0.0.40
codegen_flags: <defaults>
</compile_context>

<pallas_src>
import jax
import jax.numpy as jnp
from jax import lax
from jax.experimental import pallas as pl
from jax.experimental.pallas import tpu as pltpu


_INV_SQRT2 = 0.7071067811865475


def _gelu_exact(x):
    # torch.nn.GELU() default = exact erf formulation (kept for parity).
    return 0.5 * x * (1.0 + lax.erf(x * _INV_SQRT2))


def _round_up(x, m):
    return -(-x // m) * m


def _vmem_capacity_bytes():
    try:
        info = pltpu.get_tpu_info()
        for name in ("vmem_capacity_bytes", "vmem_bytes", "vmem_size_bytes"):
            v = getattr(info, name, None)
            if v:
                return int(v)
    except Exception:
        pass
    return 64 * 1024 * 1024  # conservative default: v7x per-TensorCore VMEM


def _vmem_budget_bytes():
    cap = _vmem_capacity_bytes()
    # Leave headroom for compiler scratch / double buffers:
    #   v7x (64 MiB)     -> ~48 MiB usable
    #   v5e/v6e (128 MiB) -> ~96 MiB usable
    budget = min((cap * 3) // 4, cap - (16 << 20))
    return max(budget, 32 << 20)


def prepare_customized_embedding_params(emb_table, w, b, *, scale=1.0,
                                        param_dtype=jnp.bfloat16):
    """One-time prep: fold scale, Linear weight and bias into a single table.

    P[i, :] = (emb_table[i] * scale) @ W + b   for i < concept_num
    P[i, :] = 0                                for padded vocab rows
    Both dims are padded to multiples of 128; stored in `param_dtype` (bf16).
    Returns (P, out_dim).
    """
    out_dim = w.shape[1]
    concept_num = emb_table.shape[0]
    p = (emb_table.astype(jnp.float32) * jnp.float32(scale)) @ w.astype(jnp.float32)
    p = p + b.astype(jnp.float32)[None, :]
    out_dim_p = _round_up(out_dim, 128)
    concept_num_p = _round_up(concept_num, 128)
    p = jnp.pad(p, ((0, concept_num_p - concept_num), (0, out_dim_p - out_dim)))
    return p.astype(param_dtype), out_dim


def _onehot_matmul_kernel(idx_ref, p_ref, out_ref):
    # idx_ref : (rows_tile, 1)              int32
    # p_ref   : (concept_num_p, out_dim_p)  bf16  (grid-invariant, single-buffered)
    # out_ref : (rows_tile, out_dim_p)
    concept_num_p = p_ref.shape[0]
    idx = idx_ref[...]                                              # (rows, 1)
    lane_ids = lax.broadcasted_iota(jnp.int32, (1, concept_num_p), 1)
    onehot = (lane_ids == idx).astype(p_ref.dtype)                  # (rows, V_p), exact
    y = jnp.dot(onehot, p_ref[...], preferred_element_type=jnp.float32)
    out_ref[...] = _gelu_exact(y).astype(out_ref.dtype)


def _row_gather_kernel(idx_ref, p_row_ref, out_ref):
    # idx_ref   : (total,) int32 in SMEM (scalar prefetch; used by the index_map)
    # p_row_ref : (1, 1, out_dim_p)  the gathered row P[idx[i]]
    # out_ref   : (1, 1, out_dim_p)
    del idx_ref
    y = p_row_ref[...].astype(jnp.float32)
    out_ref[...] = _gelu_exact(y).astype(out_ref.dtype)


def customized_embedding_forward(index, p, out_dim, *, rows_tile=256,
                                 out_dtype=jnp.float32, force_gather=None):
    bz, a = index.shape
    concept_num_p, out_dim_p = p.shape
    total = bz * a

    idx = index.reshape(total).astype(jnp.int32)
    budget = _vmem_budget_bytes()

    # ---- path selection ----------------------------------------------------
    rows_tile = max(8, min(rows_tile, _round_up(total, 8)))
    p_bytes = concept_num_p * out_dim_p * p.dtype.itemsize          # Buffered(1)
    out_bytes = 2 * rows_tile * out_dim_p * jnp.dtype(out_dtype).itemsize
    onehot_bytes = 2 * rows_tile * concept_num_p * 4                # compare/one-hot headroom
    resident_need = p_bytes + out_bytes + onehot_bytes + (2 << 20)
    use_gather = (resident_need > budget) if force_gather is None else force_gather

    if not use_gather:
        # Fast path: resident bf16 table, gather + projection fused as one-hot MXU matmul.
        total_p = _round_up(total, rows_tile)
        idx_p = idx if total_p == total else jnp.pad(idx, (0, total_p - total))
        idx_p = idx_p.reshape(total_p, 1)

        out = pl.pallas_call(
            _onehot_matmul_kernel,
            out_shape=jax.ShapeDtypeStruct((total_p, out_dim_p), out_dtype),
            grid_spec=pltpu.PrefetchScalarGridSpec(
                num_scalar_prefetch=0,
                grid=(total_p // rows_tile,),
                in_specs=[
                    pl.BlockSpec((rows_tile, 1), lambda i: (i, 0)),
                    # grid-invariant table: fetched once, single buffer
                    pl.BlockSpec((concept_num_p, out_dim_p), lambda i: (0, 0),
                                 pipeline_mode=pl.Buffered(1)),
                ],
                out_specs=pl.BlockSpec((rows_tile, out_dim_p), lambda i: (i, 0)),
            ),
            compiler_params=pltpu.CompilerParams(
                dimension_semantics=("parallel",),
                vmem_limit_bytes=budget,
            ),
        )(idx_p, p)
        if total_p != total or out_dim_p != out_dim:
            out = out[:total, :out_dim]
        return out.reshape(bz, a, out_dim)

    # ---- large-vocab fallback ------------------------------------------------
    # P stays in HBM; idx is scalar-prefetched to SMEM and drives a
    # data-dependent index_map -> Pallas auto double-buffers per-row DMAs.
    p3 = p.reshape(concept_num_p, 1, out_dim_p)
    out = pl.pallas_call(
        _row_gather_kernel,
        out_shape=jax.ShapeDtypeStruct((total, 1, out_dim_p), out_dtype),
        grid_spec=pltpu.PrefetchScalarGridSpec(
            num_scalar_prefetch=1,
            grid=(total,),
            in_specs=[
                pl.BlockSpec((1, 1, out_dim_p), lambda i, idx_ref: (idx_ref[i], 0, 0)),
            ],
            out_specs=pl.BlockSpec((1, 1, out_dim_p), lambda i, idx_ref: (i, 0, 0)),
        ),
        compiler_params=pltpu.CompilerParams(
            dimension_semantics=("arbitrary",),
        ),
    )(idx, p3)
    out = out.reshape(total, out_dim_p)[:, :out_dim]
    return out.reshape(bz, a, out_dim)


if __name__ == "__main__":
    # Shapes implied by the module: index (bz, a); emb (concept_num, concept_in_dim);
    # Linear: concept_in_dim -> concept_out_dim (present since in_dim != out_dim).
    bz, a = 2, 8
    concept_num, concept_in_dim, concept_out_dim = 32, 16, 32
    scale = 1.0
    init_range = 0.02

    key = jax.random.PRNGKey(0)
    k_emb, k_w, k_b, k_idx = jax.random.split(key, 4)

    emb_table = (init_range *
                 jax.random.normal(k_emb, (concept_num, concept_in_dim))).astype(jnp.float32)
    bound = 1.0 / (concept_in_dim ** 0.5)
    w = jax.random.uniform(k_w, (concept_in_dim, concept_out_dim),
                           minval=-bound, maxval=bound, dtype=jnp.float32)
    b = jax.random.uniform(k_b, (concept_out_dim,),
                           minval=-bound, maxval=bound, dtype=jnp.float32)
    index = jax.random.randint(k_idx, (bz, a), 0, concept_num, dtype=jnp.int32)

    # One-time parameter prep (folds scale, W and b into the bf16 table).
    p, out_dim = prepare_customized_embedding_params(emb_table, w, b, scale=scale)

    # ---- references ----------------------------------------------------------
    # Exact f32 reference (== torch module semantics, exact-erf GELU).
    pre_f32 = (jnp.take(emb_table, index, axis=0) * scale) @ w + b
    ref_f32 = jax.nn.gelu(pre_f32, approximate=False)
    # Reference using the exact same bf16-folded table the kernel consumes
    # (the one-hot / DMA gather itself is exact; only P is bf16-rounded).
    p_rows = jnp.take(p, index.reshape(-1), axis=0).astype(jnp.float32)[:, :out_dim]
    ref_bf16 = jax.nn.gelu(p_rows, approximate=False).reshape(bz, a, out_dim)

    # Fast resident-table path (one-hot MXU matmul).
    out_fast = jax.block_until_ready(customized_embedding_forward(index, p, out_dim))
    assert out_fast.shape == (bz, a, concept_out_dim)
    assert jnp.allclose(out_fast, ref_bf16, atol=1e-4, rtol=1e-4)
    assert jnp.allclose(out_fast, ref_f32, atol=5e-3, rtol=5e-2)

    # Large-vocab fallback (scalar-prefetched DMA row gather), forced here so
    # both code paths are exercised / validated at small shapes.
    out_gather = jax.block_until_ready(
        customized_embedding_forward(index, p, out_dim, force_gather=True))
    assert out_gather.shape == (bz, a, concept_out_dim)
    assert jnp.allclose(out_gather, ref_bf16, atol=1e-4, rtol=1e-4)

    print("KERNEL_OK")
</pallas_src>

<mosaic_0001>
module attributes {stable_mosaic.version = 11 : i64} {
  func.func @_onehot_matmul_kernel(%arg0: i32, %arg1: memref<16x1xi32, #tpu.memory_space<vmem>>, %arg2: memref<128x128xbf16, #tpu.memory_space<vmem>>, %arg3: memref<16x128xf32, #tpu.memory_space<vmem>>) attributes {dimension_semantics = [#tpu.dimension_semantics<parallel>], iteration_bounds = array<i64: 1>, scalar_prefetch = 0 : i64, scratch_operands = 0 : i64, tpu.core_type = #tpu.core_type<tc>, window_params = [{transform_indices = @transform_0, window_bounds = array<i64: 16, 1>}, {pipeline_mode = #tpu.pipeline_mode<synchronous>, transform_indices = @transform_1, window_bounds = array<i64: 128, 128>}, {transform_indices = @transform_2, window_bounds = array<i64: 16, 128>}]} {
    %c0 = arith.constant 0 : index
    %c0_0 = arith.constant 0 : index
    %0 = vector.load %arg1[%c0, %c0_0] : memref<16x1xi32, #tpu.memory_space<vmem>>, vector<16x1xi32>
    %1 = tpu.iota {dimensions = array<i32: 1>} : vector<1x128xi32>
    %2 = vector.broadcast %1 : vector<1x128xi32> to vector<16x128xi32>
    %3 = vector.broadcast %0 : vector<16x1xi32> to vector<16x128xi32>
    %4 = arith.cmpi eq, %2, %3 : vector<16x128xi32>
    %5 = arith.extui %4 : vector<16x128xi1> to vector<16x128xi32>
    %6 = arith.sitofp %5 : vector<16x128xi32> to vector<16x128xf32>
    %7 = arith.truncf %6 : vector<16x128xf32> to vector<16x128xbf16>
    %c0_1 = arith.constant 0 : index
    %c0_2 = arith.constant 0 : index
    %8 = vector.load %arg2[%c0_1, %c0_2] : memref<128x128xbf16, #tpu.memory_space<vmem>>, vector<128x128xbf16>
    %cst = arith.constant dense<0.000000e+00> : vector<16x128xf32>
    %9 = tpu.matmul %7, %8, %cst {dimension_numbers = #tpu.dot_dimension_numbers<[1], [0], [0], [1], [0, 0, 1, 1], [], []>} : vector<16x128xbf16>, vector<128x128xbf16>, vector<16x128xf32> -> vector<16x128xf32>
    %cst_3 = arith.constant 5.000000e-01 : f32
    %10 = vector.broadcast %cst_3 : f32 to vector<16x128xf32>
    %11 = arith.mulf %10, %9 : vector<16x128xf32>
    %cst_4 = arith.constant 0.707106769 : f32
    %12 = vector.broadcast %cst_4 : f32 to vector<16x128xf32>
    %13 = arith.mulf %9, %12 : vector<16x128xf32>
    %14 = math.erf %13 : vector<16x128xf32>
    %cst_5 = arith.constant 1.000000e+00 : f32
    %15 = vector.broadcast %cst_5 : f32 to vector<16x128xf32>
    %16 = arith.addf %15, %14 : vector<16x128xf32>
    %17 = arith.mulf %11, %16 : vector<16x128xf32>
    %c0_6 = arith.constant 0 : index
    %c0_7 = arith.constant 0 : index
    %18 = vector.load %arg3[%c0_6, %c0_7] : memref<16x128xf32, #tpu.memory_space<vmem>>, vector<16x128xf32>
    tpu.vector_store %arg3[%c0_6, %c0_7], %17 {strides = array<i32>} : memref<16x128xf32, #tpu.memory_space<vmem>>, vector<16x128xf32>,
    return
  }
  func.func @transform_0(%arg0: i32) -> (i32, i32) {
    %c0_i32 = arith.constant 0 : i32
    %c0_i32_0 = arith.constant 0 : i32
    return %arg0, %c0_i32 : i32, i32
  }
  func.func @transform_1(%arg0: i32) -> (i32, i32) {
    %c0_i32 = arith.constant 0 : i32
    %c0_i32_0 = arith.constant 0 : i32
    %c0_i32_1 = arith.constant 0 : i32
    return %c0_i32, %c0_i32_0 : i32, i32
  }
  func.func @transform_2(%arg0: i32) -> (i32, i32) {
    %c0_i32 = arith.constant 0 : i32
    %c0_i32_0 = arith.constant 0 : i32
    return %arg0, %c0_i32 : i32, i32
  }
}

</mosaic_0001>

<bundles_post_ra>
// kernel: tpu_custom_call.1
= control target key start
LH: loop header
LB: loop body
LE: loop exit
PB: predicated region body
PF: predicated region fallthrough
CT: control target
= control target key end

     0   :  { %7 = vsyncpa [#allocation3], 0  ;;  %s345_s0 = inlined_call_operand.vmem [shape: s32[16,1], index: 0, kind: input, shape index: {}]   ;;  %s346_s1 = inlined_call_operand.hbm [shape: bf16[128,128], index: 1, kind: input, shape index: {}]   ;;  %s347_s2 = inlined_call_operand.hbm [shape: f32[16,128], index: 2, kind: output, shape index: {}]  }
   0x1   :  { %8 = vsyncpa [#allocation4], 0  ;;  %s290_s9 = smov [#allocation2]   ;;  %s242_s13 = scalar_lea.hbm %s346_s1, 1024 }
   0x2   :  { %s16_s10 = sshll.u32 %s290_s9, 4  ;;  %p243_p0 = scmp.ne.s32.totalorder %s346_s1, %s242_s13  ;;  %s17_s10 = int_to_ptr.vmem [resolvable:$true] %s16_s10 }
   0x3   :  { %p246_p1 = scmp.lt.u32.totalorder %s242_s13, %s346_s1 }
   0x5   :  { %p248_p2 = pnand %p246_p1, %p243_p0 }
   0x7   :  { %251 = shalt.err (!%p248_p2)
}
   0x8   :  { %s252_s18 = scalar_lea.vmem %s17_s10, 1024  ;;  %p257_p4 = scmp.lt.s32.totalorder %s17_s10, %s17_s10 }
   0x9   :  { %p253_p3 = scmp.ne.s32.totalorder %s17_s10, %s252_s18  ;;  %p258_p5 = scmp.lt.s32.totalorder %s252_s18, %s252_s18 }
   0xb   :  { %p259_p6 = por %p258_p5, %p257_p4 }
   0xd   :  { %p260_p7 = pnand %p259_p6, %p253_p3 }
   0xf   :  { %263 = shalt.err (!%p260_p7)
}
  0x10   :  { %s291_s19 = smov 64   ;;  %s292_s20 = smov 4  }
  0x11   :  { %22 = dma.hbm_to_vmem [thread:$0]  %s346_s1, 1024, %s17_s10, [#allocation3], %s291_s19, %s291_s19, %s292_s20  }
  0x12   :  { %286 = dma.done.wait [#allocation3], 1024  }
  0x13   :  { %287 = vsyncadd [#allocation3], 4294966272  ;;  %v293_v0 = vmov 0   ;;  %v294_v1 = vmov 0.0   ;;  %v27_v2 = vld [vmem:[%s345_s0] sm:$0xff]  ;;  %v28_v4 = vld [vmem:[%s345_s0 + $0x8] sm:$0xff]  ;;  %v29_v12 = vlaneseq }
  0x14   :  { %229 = vset.pattern.permute.xlu0 %v293_v0  ;;  %199 = vmatprep.subr.bf16.mxu0 %v294_v1  ;;  %v230_v3 = vld [vmem:[#allocation2] sm:$0xff]   ;;  %v231_v5 = vld [vmem:[#allocation2 + $0x8] sm:$0xff]   ;;  %vm295_vm0 = vmmov 0   ;;  %v232_v6 = vld [vmem:[#allocation2 + $0x10] sm:$0xff]   ;;  %v296_v16 = vmov 1.0|1.0  }
  0x15   :  { %32 = vperm.xlu0 %229, %v27_v2   ;;  %200 = vmatpush3.bf16.msra.mxu0 %v230_v3  ;;  %v233_v7 = vld [vmem:[#allocation2 + $0x18] sm:$0xff]   ;;  %v234_v8 = vld [vmem:[#allocation2 + $0x20] sm:$0xff]   ;;  %v235_v9 = vld [vmem:[#allocation2 + $0x28] sm:$0xff]   ;;  %v30_v14 = vand.u32 127, %v29_v12  ;;  %s297_s0 = smov [#allocation5]  }
  0x16   :  { %201 = vmatprep.subr.bf16.mxu0 %v294_v1  ;;  %215 = vmatprep.mubr.msk.bf16.mxu0 %vm295_vm0, %v294_v1  ;;  %v236_v10 = vld [vmem:[#allocation2 + $0x30] sm:$0xff]   ;;  %v237_v11 = vld [vmem:[#allocation2 + $0x38] sm:$0xff]   ;;  %s166_s1 = sshll.u32 %s297_s0, 4  ;;  %s167_s1 = int_to_ptr.vmem [resolvable:$true] %s166_s1 }
  0x17   :  { %s264_s27 = scalar_lea.vmem %s167_s1, 256  ;;  %p269_p9 = scmp.lt.s32.totalorder %s167_s1, %s167_s1 }
  0x18   :  { %p265_p8 = scmp.ne.s32.totalorder %s167_s1, %s264_s27  ;;  %p270_p10 = scmp.lt.s32.totalorder %s264_s27, %s264_s27 }
  0x19   :  { %35 = vperm.xlu0 %229, %v28_v4   ;;  %202 = vmatpush3.bf16.msra.mxu0 %v231_v5 }
  0x1a   :  { %203 = vmatprep.subr.bf16.mxu0 %v294_v1  ;;  %p271_p11 = por %p270_p10, %p269_p9 }
  0x1c   :  { %p272_p12 = pnand %p271_p11, %p265_p8 }
  0x1d   :  { %204 = vmatpush3.bf16.msra.mxu0 %v232_v6 }
  0x1e   :  { %205 = vmatprep.subr.bf16.mxu0 %v294_v1 }
  0x21   :  { %206 = vmatpush3.bf16.msra.mxu0 %v233_v7 }
  0x22   :  { %207 = vmatprep.subr.bf16.mxu0 %v294_v1 }
  0x25   :  { %208 = vmatpush3.bf16.msra.mxu0 %v234_v8 }
  0x26   :  { %209 = vmatprep.subr.bf16.mxu0 %v294_v1 }
  0x29   :  { %210 = vmatpush3.bf16.msra.mxu0 %v235_v9 }
  0x2a   :  { %211 = vmatprep.subr.bf16.mxu0 %v294_v1 }
  0x2d   :  { %212 = vmatpush3.bf16.msra.mxu0 %v236_v10 }
  0x2e   :  { %213 = vmatprep.subr.bf16.mxu0 %v294_v1 }
  0x31   :  { %214 = vmatpush3.bf16.msra.mxu0 %v237_v11 }
  0x94   :  { %v33_v13 = vpop.permute.xlu0 %32 }
  0x95   :  { %vm37_vm1 = vcmp.eq.s32.totalorder %v30_v14, %v33_v13 }
  0x98   :  { %v36_v15 = vpop.permute.xlu0 %35 }
  0x99   :  { %vm38_vm2 = vcmp.eq.s32.totalorder %v30_v14, %v36_v15 }
  0x9a   :  { %vm188_vm3 = vmpackc.low %vm38_vm2, %vm37_vm1 }
  0x9b   :  { %216 = vmatmul.mubr.msk.bf16.vlgmr.msra.gmra.mrb[0].mxu0 %vm188_vm3, %v296_v16 }
 0x16e   :  { %v142_v17 = vpop.f32.mrb[0].mxu0 }
 0x16f   :  { %v151_v18 = vmul.f32 0.70710677, %v142_v17  ;;  %v217_v19 = vpop.f32.mrb[1].mxu0  ;;  %v149_v24 = vmul.f32 0.5, %v142_v17 }
 0x170   :  { %v145_v20 = vpop.f32.mrb[2].mxu0 }
 0x171   :  { %238 = verf.f32 %v151_v18  ;;  %v152_v21 = vmul.f32 0.70710677, %v145_v20  ;;  %v218_v22 = vpop.f32.mrb[3].mxu0  ;;  %v150_v28 = vmul.f32 0.5, %v145_v20 }
 0x173   :  { %240 = verf.f32 %v152_v21 }
 0x17b   :  { %v239_v23 = vpop.eup %238 }
 0x17c   :  { %v155_v25 = vadd.f32 1.0, %v239_v23 }
 0x17d   :  { %v241_v26 = vpop.eup %240 }
 0x17e   :  { %v157_v27 = vmul.f32 %v155_v25, %v149_v24  ;;  %v156_v29 = vadd.f32 1.0, %v241_v26 }
 0x180   :  { %159 = vst [vmem:[#allocation5] sm:$0xff] %v157_v27  ;;  %v158_v30 = vmul.f32 %v156_v29, %v150_v28 }
 0x182   :  { %160 = vst [vmem:[#allocation5 + $0x8] sm:$0xff] %v158_v30 }
 0x183   :  { %275 = shalt.err (!%p272_p12)
}
 0x184   :  { %s276_s30 = scalar_lea.hbm %s347_s2, 256 }
 0x185   :  { %p277_p13 = scmp.ne.s32.totalorder %s347_s2, %s276_s30  ;;  %p280_p0 = scmp.lt.u32.totalorder %s276_s30, %s347_s2 }
 0x187   :  { %p282_p1 = pnand %p280_p0, %p277_p13 }
 0x189   :  { %285 = shalt.err (!%p282_p1)
}
 0x18a   :  { %s298_s7 = smov 128   ;;  %s299_s8 = smov 8  }
 0x18b   :  { %172 = dma.vmem_to_hbm [thread:$0]  %s167_s1, 256, %s347_s2, [#allocation4], %s298_s7, %s298_s7, %s299_s8  }
 0x18c   :  { %288 = dma.done.wait [#allocation4], 256  }
 0x18d   :  { %289 = vsyncadd [#allocation4], 4294967040 }
 0x18e   :  { %176 = vsyncpa [#allocation3], 1 }
 0x18f   :  { %177 = vsyncpa [#allocation4], 1 }

</bundles_post_ra>
